<compile_context>
chip_gen: v7x
topology: tpu7x:2x2x1
jax: 0.10.0
libtpu: 0.0.40
codegen_flags: <defaults>
</compile_context>

<pallas_src>
import functools

import jax
import jax.numpy as jnp
from jax import lax
from jax.experimental import pallas as pl
from jax.experimental.pallas import tpu as pltpu


def _round_up(x, m):
    return ((x + m - 1) // m) * m


def _supcon_kernel(row_lab_ref, col_lab_ref, q_ref, f_ref, out_ref, *,
                   inv_temp, loss_scale, n_valid_rows, n_valid_cols, tm):
    # row_lab_ref: [TM, 1]        int32 labels for this anchor-row tile
    # col_lab_ref: [1, N_pad]     int32 labels for all contrast columns (resident)
    # q_ref:       [TM, D_pad]    anchor-feature tile
    # f_ref:       [N_pad, D_pad] full contrast matrix (resident across the grid)
    # out_ref:     [8, 128]       per-tile partial loss (scalar broadcast, lane-dense)
    i = pl.program_id(0)

    # MXU matmul contracting on D -- no explicit transpose of f.
    raw = lax.dot_general(
        q_ref[...], f_ref[...],
        dimension_numbers=(((1,), (1,)), ((), ())),
        preferred_element_type=jnp.float32)                   # [TM, N_pad] f32

    n_pad = raw.shape[1]
    row_ids = i * tm + lax.broadcasted_iota(jnp.int32, (tm, n_pad), 0)
    col_ids = lax.broadcasted_iota(jnp.int32, (tm, n_pad), 1)

    col_valid = col_ids < n_valid_cols                          # excludes pad columns
    lmask = jnp.logical_and(row_ids != col_ids, col_valid)      # + self-exclusion
    pos = jnp.logical_and(row_lab_ref[...] == col_lab_ref[...], lmask)

    # Numerically-stable log-softmax; max over all *valid* columns (self column
    # included), matching the PyTorch reference.  Since 1/T > 0, applying it to
    # the max-shifted logits is exactly (logits - logits_max) of the reference.
    m = jnp.max(jnp.where(col_valid, raw, -jnp.inf), axis=1, keepdims=True)
    shifted = (raw - m) * inv_temp                              # [TM, N_pad]

    denom = jnp.sum(jnp.where(lmask, jnp.exp(shifted), 0.0),
                    axis=1, keepdims=True)                      # [TM, 1]
    log_denom = jnp.log(denom)

    # mean_log_prob_pos = sum(pos * (shifted - log_denom)) / count(pos)
    #                   = (sum(pos*shifted) - count*log_denom) / count
    # (algebraic form: no full log_prob slab is materialized)
    pos_f = pos.astype(jnp.float32)
    s_pos = jnp.sum(shifted * pos_f, axis=1, keepdims=True)
    cnt = jnp.sum(pos_f, axis=1, keepdims=True)
    mlpp = (s_pos - cnt * log_denom) / jnp.maximum(cnt, 1.0)    # clamp: no NaN

    row_valid = (row_ids[:, :1] < n_valid_rows).astype(jnp.float32)  # [TM, 1]
    tile_sum = jnp.sum(mlpp * row_valid)                        # scalar

    # loss_scale = -(T / base_T) / n_anchor folds the final mean in here.
    # Broadcast so the store is a full, unmasked lane-dense (8,128) block;
    # the wrapper reads element [0, 0] of each tile block.
    out_ref[...] = jnp.broadcast_to(tile_sum * loss_scale, out_ref.shape
                                    ).astype(out_ref.dtype)


def supcon_loss(features, labels=None, mask=None, *, temperature=0.07,
                contrast_mode='all', base_temperature=0.07, block_rows=None):
    """JAX/Pallas equivalent of SupConLoss.forward (contrast_mode 'all' or 'one')."""
    if features.ndim < 3:
        raise ValueError('`features` needs to be [bsz, n_views, ...]')
    if features.ndim > 3:
        features = features.reshape(features.shape[0], features.shape[1], -1)
    if contrast_mode not in ('all', 'one'):
        raise ValueError('Unknown mode: {}'.format(contrast_mode))

    bsz, n_views, dim = features.shape
    if labels is not None and mask is not None:
        raise ValueError('Cannot define both `labels` and `mask`')
    if mask is not None:
        # TODO(synk): arbitrary (possibly asymmetric) [bsz,bsz] masks need a
        # mask-input kernel variant; only the labels / SimCLR paths are fused here.
        raise NotImplementedError('explicit `mask` is not supported by the Pallas path')
    if labels is None:
        labels = jnp.arange(bsz, dtype=jnp.int32)   # eye(bsz) == same-index labels
    labels = jnp.asarray(labels).reshape(-1).astype(jnp.int32)
    if labels.shape[0] != bsz:
        raise ValueError('Num of labels does not match num of features')

    n_total = bsz * n_views
    n_anchor = bsz if contrast_mode == 'one' else n_total

    # view-major stacking == torch.cat(torch.unbind(features, dim=1), dim=0);
    # in 'one' mode the anchors are exactly the first `bsz` rows of this matrix.
    cf = jnp.transpose(features, (1, 0, 2)).reshape(n_total, dim)
    labels_tiled = jnp.tile(labels, n_views)                      # [N]

    itemsize = jnp.dtype(cf.dtype).itemsize
    d_pad = _round_up(dim, 128)                    # lane-dense loads / MXU feed

    if block_rows is not None:
        tm = _round_up(max(8, min(int(block_rows), n_anchor)), 8)
    else:
        tm = min(256, _round_up(n_anchor, 8))
        # Shrink the row tile until the VMEM working set (resident contrast
        # matrix + double-buffered anchor tiles + f32 temporaries) fits.
        while tm > 8:
            n_try = _round_up(n_total, tm)
            est = (n_try * d_pad * itemsize + 2 * tm * d_pad * itemsize
                   + 6 * tm * n_try * 4)
            if est <= 48 * 1024 * 1024:
                break
            tm = _round_up(tm // 2, 8)

    n_pad = _round_up(n_total, tm)            # contrast columns (>= anchor rows)
    n_anchor_pad = _round_up(n_anchor, tm)
    num_tiles = n_anchor_pad // tm

    if n_pad != n_total or d_pad != dim:
        cf = jnp.pad(cf, ((0, n_pad - n_total), (0, d_pad - dim)))
    if n_pad != n_total:
        labels_tiled = jnp.pad(labels_tiled, (0, n_pad - n_total),
                               constant_values=-1)

    row_labels = labels_tiled.reshape(n_pad, 1)
    col_labels = labels_tiled.reshape(1, n_pad)

    kernel = functools.partial(
        _supcon_kernel,
        inv_temp=1.0 / float(temperature),
        loss_scale=-(float(temperature) / float(base_temperature)) / float(n_anchor),
        n_valid_rows=n_anchor,
        n_valid_cols=n_total,
        tm=tm)

    vmem_est = (n_pad * d_pad * itemsize          # resident contrast matrix
                + 2 * tm * d_pad * itemsize       # double-buffered anchor tiles
                + 2 * (tm + n_pad) * 4            # label blocks
                + 6 * tm * n_pad * 4              # in-kernel f32 temporaries
                + 2 * 8 * 128 * 4)                # output blocks
    vmem_limit = int(min(max(2 * vmem_est, 32 * 1024 * 1024), 60 * 1024 * 1024))

    out = pl.pallas_call(
        kernel,
        out_shape=jax.ShapeDtypeStruct((num_tiles * 8, 128), jnp.float32),
        grid=(num_tiles,),
        in_specs=[
            pl.BlockSpec((tm, 1), lambda i: (i, 0)),         # row labels (per tile)
            pl.BlockSpec((1, n_pad), lambda i: (0, 0)),      # col labels (resident)
            pl.BlockSpec((tm, d_pad), lambda i: (i, 0)),     # anchor tile
            pl.BlockSpec((n_pad, d_pad), lambda i: (0, 0)),  # contrast matrix (resident)
        ],
        out_specs=pl.BlockSpec((8, 128), lambda i: (i, 0)),
        compiler_params=pltpu.CompilerParams(
            dimension_semantics=("parallel",),               # megacore-shardable
            vmem_limit_bytes=vmem_limit),
        cost_estimate=pl.CostEstimate(
            flops=2 * n_anchor_pad * n_pad * d_pad,
            transcendentals=n_anchor_pad * n_pad,
            bytes_accessed=(n_pad + n_anchor_pad) * d_pad * itemsize
                           + 8 * n_pad + num_tiles * 8 * 128 * 4),
    )(row_labels, col_labels, cf, cf)

    # Each grid step wrote its (already scaled) partial sum into its own block.
    return jnp.sum(out.reshape(num_tiles, 8, 128)[:, 0, 0])


def _supcon_loss_ref(features, labels, *, temperature=0.07, base_temperature=0.07,
                     contrast_mode='all'):
    """Pure-JAX reference mirroring the PyTorch code."""
    bsz, n_views, _ = features.shape
    base_mask = (labels.reshape(-1, 1) == labels.reshape(1, -1)).astype(jnp.float32)
    cf = jnp.concatenate([features[:, v, :] for v in range(n_views)], axis=0)
    if contrast_mode == 'one':
        anchor, anchor_count = features[:, 0, :], 1
    else:
        anchor, anchor_count = cf, n_views
    adc = (anchor @ cf.T) / temperature
    logits = adc - jnp.max(adc, axis=1, keepdims=True)
    mask = jnp.tile(base_mask, (anchor_count, n_views))
    n_anchor = anchor.shape[0]
    lmask = jnp.ones_like(mask).at[jnp.arange(n_anchor), jnp.arange(n_anchor)].set(0.0)
    mask = mask * lmask
    exp_logits = jnp.exp(logits) * lmask
    log_prob = logits - jnp.log(exp_logits.sum(1, keepdims=True))
    mlpp = (mask * log_prob).sum(1) / mask.sum(1)
    return (-(temperature / base_temperature) * mlpp).mean()


if __name__ == "__main__":
    key = jax.random.PRNGKey(0)
    k1, k2, k3, k4 = jax.random.split(key, 4)

    # Case 1: supervised, single row-tile.
    bsz, n_views, dim = 4, 2, 32
    feats = jax.random.normal(k1, (bsz, n_views, dim), dtype=jnp.float32)
    feats = feats / jnp.linalg.norm(feats, axis=-1, keepdims=True)
    labels = jax.random.randint(k2, (bsz,), 0, 2)
    loss = jax.block_until_ready(supcon_loss(feats, labels=labels))
    ref = _supcon_loss_ref(feats, labels)
    assert jnp.allclose(loss, ref, atol=1e-4, rtol=1e-4), (loss, ref)

    # Case 2: supervised, multi-tile grid with row padding (N=10 -> N_pad=16, TM=8).
    bsz2, n_views2, dim2 = 5, 2, 64
    feats2 = jax.random.normal(k3, (bsz2, n_views2, dim2), dtype=jnp.float32)
    feats2 = feats2 / jnp.linalg.norm(feats2, axis=-1, keepdims=True)
    labels2 = jax.random.randint(k4, (bsz2,), 0, 3)
    loss2 = jax.block_until_ready(supcon_loss(feats2, labels=labels2, block_rows=8))
    ref2 = _supcon_loss_ref(feats2, labels2)
    assert jnp.allclose(loss2, ref2, atol=1e-4, rtol=1e-4), (loss2, ref2)

    # Case 3: SimCLR degenerate case (labels=None, mask=None) == per-sample labels.
    loss3 = jax.block_until_ready(supcon_loss(feats))
    ref3 = _supcon_loss_ref(feats, jnp.arange(bsz))
    assert jnp.allclose(loss3, ref3, atol=1e-4, rtol=1e-4), (loss3, ref3)

    # Case 4: contrast_mode='one' (anchors are the view-0 features only).
    loss4 = jax.block_until_ready(
        supcon_loss(feats2, labels=labels2, contrast_mode='one'))
    ref4 = _supcon_loss_ref(feats2, labels2, contrast_mode='one')
    assert jnp.allclose(loss4, ref4, atol=1e-4, rtol=1e-4), (loss4, ref4)

    print("KERNEL_OK")
</pallas_src>

<mosaic_0001>
module attributes {stable_mosaic.version = 11 : i64} {
  func.func @_supcon_kernel(%arg0: i32, %arg1: memref<8x1xi32, #tpu.memory_space<vmem>>, %arg2: memref<1x8xi32, #tpu.memory_space<vmem>>, %arg3: memref<8x128xf32, #tpu.memory_space<vmem>>, %arg4: memref<8x128xf32, #tpu.memory_space<vmem>>, %arg5: memref<8x128xf32, #tpu.memory_space<vmem>>) attributes {dimension_semantics = [#tpu.dimension_semantics<parallel>], iteration_bounds = array<i64: 1>, scalar_prefetch = 0 : i64, scratch_operands = 0 : i64, tpu.core_type = #tpu.core_type<tc>, window_params = [{transform_indices = @transform_0, window_bounds = array<i64: 8, 1>}, {pipeline_mode = #tpu.pipeline_mode<synchronous>, transform_indices = @transform_1, window_bounds = array<i64: 1, 8>}, {transform_indices = @transform_2, window_bounds = array<i64: 8, 128>}, {pipeline_mode = #tpu.pipeline_mode<synchronous>, transform_indices = @transform_3, window_bounds = array<i64: 8, 128>}, {transform_indices = @transform_4, window_bounds = array<i64: 8, 128>}]} {
    %c0 = arith.constant 0 : index
    %c0_0 = arith.constant 0 : index
    %0 = vector.load %arg3[%c0, %c0_0] : memref<8x128xf32, #tpu.memory_space<vmem>>, vector<8x128xf32>
    %c0_1 = arith.constant 0 : index
    %c0_2 = arith.constant 0 : index
    %1 = vector.load %arg4[%c0_1, %c0_2] : memref<8x128xf32, #tpu.memory_space<vmem>>, vector<8x128xf32>
    %cst = arith.constant dense<0.000000e+00> : vector<8x8xf32>
    %2 = tpu.matmul %0, %1, %cst {dimension_numbers = #tpu.dot_dimension_numbers<[1], [1], [0], [0], [0, 0, 1, 0], [], []>} : vector<8x128xf32>, vector<8x128xf32>, vector<8x8xf32> -> vector<8x8xf32>
    %c8_i32 = arith.constant 8 : i32
    %3 = arith.muli %arg0, %c8_i32 : i32
    %4 = tpu.iota {dimensions = array<i32: 0>} : vector<8x8xi32>
    %5 = vector.broadcast %3 : i32 to vector<8x8xi32>
    %6 = arith.addi %5, %4 : vector<8x8xi32>
    %7 = tpu.iota {dimensions = array<i32: 1>} : vector<8x8xi32>
    %c8_i32_3 = arith.constant 8 : i32
    %8 = vector.broadcast %c8_i32_3 : i32 to vector<8x8xi32>
    %9 = arith.cmpi slt, %7, %8 : vector<8x8xi32>
    %10 = arith.cmpi ne, %6, %7 : vector<8x8xi32>
    %11 = arith.andi %10, %9 : vector<8x8xi1>
    %c0_4 = arith.constant 0 : index
    %c0_5 = arith.constant 0 : index
    %12 = vector.load %arg1[%c0_4, %c0_5] : memref<8x1xi32, #tpu.memory_space<vmem>>, vector<8x1xi32>
    %c0_6 = arith.constant 0 : index
    %c0_7 = arith.constant 0 : index
    %13 = vector.load %arg2[%c0_6, %c0_7] : memref<1x8xi32, #tpu.memory_space<vmem>>, vector<1x8xi32>
    %14 = vector.broadcast %12 : vector<8x1xi32> to vector<8x8xi32>
    %15 = vector.broadcast %13 : vector<1x8xi32> to vector<8x8xi32>
    %16 = arith.cmpi eq, %14, %15 : vector<8x8xi32>
    %17 = arith.andi %16, %11 : vector<8x8xi1>
    %cst_8 = arith.constant 0xFF800000 : f32
    %18 = vector.broadcast %cst_8 : f32 to vector<8x8xf32>
    %19 = arith.select %9, %2, %18 : vector<8x8xi1>, vector<8x8xf32>
    %cst_9 = arith.constant dense<0xFF800000> : vector<8xf32>
    %20 = vector.multi_reduction <maximumf>, %19, %cst_9 [1] : vector<8x8xf32> to vector<8xf32>
    %21 = vector.shape_cast %20 : vector<8xf32> to vector<8x1xf32>
    %22 = vector.broadcast %21 : vector<8x1xf32> to vector<8x8xf32>
    %23 = arith.subf %2, %22 : vector<8x8xf32>
    %cst_10 = arith.constant 14.2857141 : f32
    %24 = vector.broadcast %cst_10 : f32 to vector<8x8xf32>
    %25 = arith.mulf %23, %24 : vector<8x8xf32>
    %26 = math.exp %25 : vector<8x8xf32>
    %cst_11 = arith.constant 0.000000e+00 : f32
    %27 = vector.broadcast %cst_11 : f32 to vector<8x8xf32>
    %28 = arith.select %11, %26, %27 : vector<8x8xi1>, vector<8x8xf32>
    %cst_12 = arith.constant dense<0.000000e+00> : vector<8xf32>
    %29 = vector.multi_reduction <add>, %28, %cst_12 [1] : vector<8x8xf32> to vector<8xf32>
    %30 = vector.shape_cast %29 : vector<8xf32> to vector<8x1xf32>
    %31 = math.log %30 : vector<8x1xf32>
    %32 = arith.extui %17 : vector<8x8xi1> to vector<8x8xi32>
    %33 = arith.sitofp %32 : vector<8x8xi32> to vector<8x8xf32>
    %34 = arith.mulf %25, %33 : vector<8x8xf32>
    %cst_13 = arith.constant dense<0.000000e+00> : vector<8xf32>
    %35 = vector.multi_reduction <add>, %34, %cst_13 [1] : vector<8x8xf32> to vector<8xf32>
    %36 = vector.shape_cast %35 : vector<8xf32> to vector<8x1xf32>
    %cst_14 = arith.constant dense<0.000000e+00> : vector<8xf32>
    %37 = vector.multi_reduction <add>, %33, %cst_14 [1] : vector<8x8xf32> to vector<8xf32>
    %38 = vector.shape_cast %37 : vector<8xf32> to vector<8x1xf32>
    %39 = arith.mulf %38, %31 : vector<8x1xf32>
    %40 = arith.subf %36, %39 : vector<8x1xf32>
    %cst_15 = arith.constant 1.000000e+00 : f32
    %41 = vector.broadcast %cst_15 : f32 to vector<8x1xf32>
    %42 = arith.maximumf %38, %41 : vector<8x1xf32>
    %43 = arith.divf %40, %42 : vector<8x1xf32>
    %44 = vector.extract_strided_slice %6 {offsets = [0, 0], sizes = [8, 1], strides = [1, 1]} : vector<8x8xi32> to vector<8x1xi32>
    %c8_i32_16 = arith.constant 8 : i32
    %45 = vector.broadcast %c8_i32_16 : i32 to vector<8x1xi32>
    %46 = arith.cmpi slt, %44, %45 : vector<8x1xi32>
    %47 = arith.extui %46 : vector<8x1xi1> to vector<8x1xi32>
    %48 = arith.sitofp %47 : vector<8x1xi32> to vector<8x1xf32>
    %49 = arith.mulf %43, %48 : vector<8x1xf32>
    %50 = vector.shape_cast %49 : vector<8x1xf32> to vector<1x8x1xf32>
    %cst_17 = arith.constant dense<0.000000e+00> : vector<1xf32>
    %51 = vector.multi_reduction <add>, %50, %cst_17 [1, 2] : vector<1x8x1xf32> to vector<1xf32>
    %52 = vector.shape_cast %51 : vector<1xf32> to vector<1x1x1xf32>
    %53 = vector.extract %52[0, 0, 0] : f32 from vector<1x1x1xf32>
    %cst_18 = arith.constant -1.250000e-01 : f32
    %54 = arith.mulf %53, %cst_18 : f32
    %55 = vector.broadcast %54 : f32 to vector<8x128xf32>
    %c0_19 = arith.constant 0 : index
    %c0_20 = arith.constant 0 : index
    %56 = vector.load %arg5[%c0_19, %c0_20] : memref<8x128xf32, #tpu.memory_space<vmem>>, vector<8x128xf32>
    tpu.vector_store %arg5[%c0_19, %c0_20], %55 {strides = array<i32>} : memref<8x128xf32, #tpu.memory_space<vmem>>, vector<8x128xf32>,
    return
  }
  func.func @transform_0(%arg0: i32) -> (i32, i32) {
    %c0_i32 = arith.constant 0 : i32
    %c0_i32_0 = arith.constant 0 : i32
    return %arg0, %c0_i32 : i32, i32
  }
  func.func @transform_1(%arg0: i32) -> (i32, i32) {
    %c0_i32 = arith.constant 0 : i32
    %c0_i32_0 = arith.constant 0 : i32
    %c0_i32_1 = arith.constant 0 : i32
    return %c0_i32, %c0_i32_0 : i32, i32
  }
  func.func @transform_2(%arg0: i32) -> (i32, i32) {
    %c0_i32 = arith.constant 0 : i32
    %c0_i32_0 = arith.constant 0 : i32
    return %arg0, %c0_i32 : i32, i32
  }
  func.func @transform_3(%arg0: i32) -> (i32, i32) {
    %c0_i32 = arith.constant 0 : i32
    %c0_i32_0 = arith.constant 0 : i32
    %c0_i32_1 = arith.constant 0 : i32
    return %c0_i32, %c0_i32_0 : i32, i32
  }
  func.func @transform_4(%arg0: i32) -> (i32, i32) {
    %c0_i32 = arith.constant 0 : i32
    %c0_i32_0 = arith.constant 0 : i32
    return %arg0, %c0_i32 : i32, i32
  }
}

</mosaic_0001>

<bundles_post_ra>
// kernel: tpu_custom_call.1
= control target key start
LH: loop header
LB: loop body
LE: loop exit
PB: predicated region body
PF: predicated region fallthrough
CT: control target
= control target key end

     0   :  { %9 = vsyncpa [#allocation3], 0  ;;  %s325_s0 = inlined_call_operand.vmem [shape: s32[8,1], index: 0, kind: input, shape index: {}]   ;;  %s326_s1 = inlined_call_operand.hbm [shape: s32[1,8], index: 1, kind: input, shape index: {}]   ;;  %s327_s2 = inlined_call_operand.vmem [shape: f32[8,128], index: 2, kind: input, shape index: {}]   ;;  %s328_s3 = inlined_call_operand.vmem [shape: f32[8,128], index: 3, kind: input, shape index: {}]   ;;  %s329_s4 = inlined_call_operand.hbm [shape: f32[8,128], index: 4, kind: output, shape index: {}]  }
   0x1   :  { %10 = vsyncpa [#allocation4], 0  ;;  %s256_s15 = smov [#allocation2]   ;;  %s208_s19 = scalar_lea.hbm %s326_s1, 16 }
   0x2   :  { %s19_s16 = sshll.u32 %s256_s15, 4  ;;  %p209_p0 = scmp.ne.s32.totalorder %s326_s1, %s208_s19  ;;  %s20_s16 = int_to_ptr.vmem [resolvable:$true] %s19_s16 }
   0x3   :  { %p212_p1 = scmp.lt.u32.totalorder %s208_s19, %s326_s1 }
   0x5   :  { %p214_p2 = pnand %p212_p1, %p209_p0 }
   0x7   :  { %217 = shalt.err (!%p214_p2)
}
   0x8   :  { %s218_s24 = scalar_lea.vmem %s20_s16, 16  ;;  %s222_s25 = scalar_lea.vmem %s20_s16, 32 }
   0x9   :  { %p219_p3 = scmp.ne.s32.totalorder %s20_s16, %s218_s24  ;;  %p223_p4 = scmp.lt.s32.totalorder %s20_s16, %s20_s16 }
   0xa   :  { %p224_p5 = scmp.lt.s32.totalorder %s222_s25, %s218_s24 }
   0xc   :  { %p225_p6 = por %p224_p5, %p223_p4 }
   0xe   :  { %p226_p7 = pnand %p225_p6, %p219_p3 }
  0x10   :  { %229 = shalt.err (!%p226_p7)
}
  0x11   :  { %22 = dma.hbm_to_vmem [thread:$0]  %s326_s1, 16, %s20_s16, [#allocation3]  }
  0x12   :  { %252 = dma.done.wait [#allocation3], 16  }
  0x13   :  { %253 = vsyncadd [#allocation3], 4294967280  ;;  %v257_v0 = vmov 0.0   ;;  %vm258_vm0 = vmmov 0   ;;  %v31_v1 = vld [vmem:[%s328_s3] sm:$0xff]  ;;  %v259_v3 = vmov 0   ;;  %v103_v4 = vlaneseq }
  0x14   :  { %189 = vmatprep.subr.mxu0 %v257_v0  ;;  %191 = vmatprep.mubr.msk.f32.mxu0 %vm258_vm0, %v257_v0  ;;  %v30_v2 = vld [vmem:[%s327_s2] sm:$0xff]  ;;  %vm124_vm2 = vcmask 64512   ;;  %v185_v16 = vld [vmem:[#allocation2] ss:$0 sm:$0xff]  ;;  %vm156_vm7 = vcmask 7168  }
  0x15   :  { %190 = vmatpush3.xpose.msra.mxu0 %v31_v1  ;;  %201 = vset.pattern.permute.xlu0 %v259_v3  ;;  %v108_v5 = vand.u32 127, %v103_v4  ;;  %v112_v10 = vld [vmem:[%s325_s0] sm:$0xff]  ;;  %v104_v12 = vshrl.u32 %v103_v4, 7  ;;  %s260_s0 = smov [#allocation5]  }
  0x16   :  { %s176_s2 = sshll.u32 %s260_s0, 4  ;;  %s177_s2 = int_to_ptr.vmem [resolvable:$true] %s176_s2 }
  0x17   :  { %vm109_vm1 = vcmp.lt.s32.totalorder %v108_v5, 8  ;;  %vm110_vm3 = vcmp.ne.s32.totalorder %v104_v12, %v108_v5  ;;  %s230_s8 = scalar_lea.vmem %s177_s2, 128  ;;  %p235_p9 = scmp.lt.s32.totalorder %s177_s2, %s177_s2 }
  0x18   :  { %192 = vmatmul.mubr.f32.vlgmr.msra.gmra.mrb[0].mxu0 %v30_v2  ;;  %vm111_vm4 = vmand %vm110_vm3, %vm109_vm1  ;;  %p231_p8 = scmp.ne.s32.totalorder %s177_s2, %s230_s8  ;;  %p236_p10 = scmp.lt.s32.totalorder %s230_s8, %s230_s8 }
  0x1a   :  { %p237_p11 = por %p236_p10, %p235_p9 }
  0x1c   :  { %p238_p12 = pnand %p237_p11, %p231_p8 }
  0xeb   :  { %v98_v6 = vpop.f32.mrb[0].mxu0 }
  0xec   :  { %v193_v7 = vpop.f32.mrb[1].mxu0  ;;  %v123_v8 = vsel %vm109_vm1, %v98_v6, -inf }
  0xed   :  { %v125_v9 = vsel %vm124_vm2, %v123_v8, -inf }
  0xee   :  { %126 = vmax.xlane.f32.xlu0 %v125_v9 }
 0x104   :  { %115 = vperm.xlu0 %201, %v112_v10  }
 0x17b   :  { %v127_v11 = vpop.xlane.xlu0 %126 }
 0x17c   :  { %v128_v13 = vsub.f32 %v98_v6, %v127_v11 }
 0x17e   :  { %v129_v14 = vmul.f32 14.285714, %v128_v13 }
 0x180   :  { %v130_v15 = vmul.f32 1.442695, %v129_v14 }
 0x182   :  { %202 = vpow2.f32 %v130_v15 }
 0x183   :  { %v116_v17 = vpop.permute.xlu0 %115 }
 0x184   :  { %vm121_vm5 = vcmp.eq.s32.totalorder %v116_v17, %v185_v16 }
 0x185   :  { %vm122_vm6 = vmand %vm121_vm5, %vm111_vm4 }
 0x186   :  { %v186_v18 = vsel %vm122_vm6, 1.0, %v257_v0 }
 0x187   :  { %v140_v19 = vmul.f32 %v186_v18, %v129_v14  ;;  %v144_v23 = vsel %vm124_vm2, %v186_v18, 0.0 }
 0x189   :  { %v141_v24 = vsel %vm124_vm2, %v140_v19, 0.0 }
 0x18c   :  { %v203_v20 = vpop.eup %202 }
 0x18d   :  { %v132_v21 = vsel %vm111_vm4, %v203_v20, 0.0 }
 0x18e   :  { %v133_v22 = vsel %vm124_vm2, %v132_v21, 0.0 }
 0x18f   :  { %134 = vadd.xlane.f32.xlu1 %v133_v22 }
 0x193   :  { %145 = vadd.xlane.f32.xlu1 %v144_v23 }
 0x197   :  { %142 = vadd.xlane.f32.xlu1 %v141_v24 }
 0x21c   :  { %v135_v25 = vpop.xlane.xlu1 %134 }
 0x21d   :  { %204 = vlog2.f32 %v135_v25 }
 0x220   :  { %v146_v26 = vpop.xlane.xlu1 %145 }
 0x221   :  { %v149_v27 = vmax.f32 %v146_v26, 1.0 }
 0x223   :  { %206 = vrcp.f32 %v149_v27 }
 0x224   :  { %v143_v31 = vpop.xlane.xlu1 %142 }
 0x227   :  { %v205_v28 = vpop.eup %204 }
 0x228   :  { %v137_v29 = vmul.f32 0.6931472, %v205_v28 }
 0x22a   :  { %v147_v30 = vmul.f32 %v146_v26, %v137_v29 }
 0x22c   :  { %v148_v32 = vsub.f32 %v143_v31, %v147_v30 }
 0x22d   :  { %v207_v33 = vpop.eup %206 }
 0x22e   :  { %v151_v34 = vmul.f32 %v207_v33, %v148_v32 }
 0x230   :  { %v157_v35 = vsel %vm156_vm7, %v151_v34, 0.0 }
 0x231   :  { %158 = vadd.xlane.f32.xlu1 %v157_v35 }
 0x2be   :  { %v159_v36 = vpop.xlane.xlu1 %158 }
 0x2bf   :  { %v160_v37 = vrot.slane %v159_v36, 4 }
 0x2c1   :  { %v161_v38 = vadd.f32 %v160_v37, %v159_v36 }
 0x2c3   :  { %v162_v39 = vrot.slane %v161_v38, 2 }
 0x2c5   :  { %v163_v40 = vadd.f32 %v162_v39, %v161_v38 }
 0x2c7   :  { %v164_v41 = vrot.slane %v163_v40, 1 }
 0x2c9   :  { %v165_v42 = vadd.f32 %v164_v41, %v163_v40 }
 0x2cb   :  { %194 = vpush %v165_v42 }
 0x2fc   :  { %s195_s6 = spop %194 }
 0x2fd   :  { %s167_s7 = smul.f32 -0.125, %s195_s6 }
 0x2ff   :  { %v168_v43 = vstv %s167_s7 }
 0x300   :  { %169 = vst [vmem:[#allocation5] sm:$0xff] %v168_v43 }
 0x301   :  { %241 = shalt.err (!%p238_p12)
}
 0x302   :  { %s242_s11 = scalar_lea.hbm %s329_s4, 128 }
 0x303   :  { %p243_p13 = scmp.ne.s32.totalorder %s329_s4, %s242_s11  ;;  %p246_p0 = scmp.lt.u32.totalorder %s242_s11, %s329_s4 }
 0x305   :  { %p248_p1 = pnand %p246_p0, %p243_p13 }
 0x307   :  { %251 = shalt.err (!%p248_p1)
}
 0x308   :  { %179 = dma.vmem_to_hbm [thread:$0]  %s177_s2, 128, %s329_s4, [#allocation4]  }
 0x309   :  { %254 = dma.done.wait [#allocation4], 128  }
 0x30a   :  { %255 = vsyncadd [#allocation4], 4294967168 }
 0x30b   :  { %183 = vsyncpa [#allocation3], 1 }
 0x30c   :  { %184 = vsyncpa [#allocation4], 1 }

</bundles_post_ra>
